<compile_context>
chip_gen: v7x
topology: tpu7x:2x2x1
jax: 0.10.0
libtpu: 0.0.40
codegen_flags: <defaults>
</compile_context>

<pallas_src>
import functools
import jax
import jax.numpy as jnp
from jax.experimental import pallas as pl
from jax.experimental.pallas import tpu as pltpu

INPUT_DIM = 64
DIMS = [INPUT_DIM, 250, 180, 100, 25, 1]   # layer widths of the MLP
LANE = 128


def _round_up(n, m):
    return ((n + m - 1) // m) * m


# ----------------------------------------------------------------------------
# Kernel
# ----------------------------------------------------------------------------
def mlp_kernel(x_ref,
               w1_ref, b1_ref,
               w2_ref, b2_ref,
               w3_ref, b3_ref,
               w4_ref, b4_ref,
               w5_ref, b5_ref,
               o_ref):
    def dense_relu(h, w_ref, b_ref):
        # bf16 MXU inputs, f32 accumulation; bias + ReLU in f32.
        y = jnp.dot(h, w_ref[...], preferred_element_type=jnp.float32) + b_ref[...]
        return jnp.maximum(y, 0.0)

    h = x_ref[...]                                        # bf16 [TB, 64]
    h = dense_relu(h, w1_ref, b1_ref)                     # f32  [TB, 256]
    h = dense_relu(h.astype(jnp.bfloat16), w2_ref, b2_ref)  # f32 [TB, 256]
    h = dense_relu(h.astype(jnp.bfloat16), w3_ref, b3_ref)  # f32 [TB, 128]
    h = dense_relu(h.astype(jnp.bfloat16), w4_ref, b4_ref)  # f32 [TB, 128]

    # Final 25->1 layer: VPU multiply + XLU lane reduction (no N=1 MXU pass).
    # w5_ref is a zero-padded [1, 128] f32 row; padded lanes contribute 0.
    y = jnp.sum(h * w5_ref[...], axis=-1, keepdims=True) + b5_ref[...]
    o_ref[...] = y.astype(o_ref.dtype)


# ----------------------------------------------------------------------------
# Wrapper
# ----------------------------------------------------------------------------
def prepare_params(params):
    """Pad layer widths to lane multiples, cast weights to bf16.

    `params` is a list of (w, b) with w:[in, out] (transposed vs. PyTorch),
    b:[1, out].  Returns the flat operand list expected by the kernel.
    Padded bias entries are exactly 0 so ReLU keeps padded columns at 0 and
    the next layer's zero-padded rows cannot leak anything.
    """
    flat = []
    in_p = params[0][0].shape[0]                 # input features (64), unpadded
    for (w, b) in params[:-1]:                   # the four ReLU layers
        fi, fo = w.shape
        fo_p = _round_up(fo, LANE)
        wp = jnp.zeros((in_p, fo_p), jnp.float32).at[:fi, :fo].set(w)
        bp = jnp.zeros((1, fo_p), jnp.float32).at[:, :fo].set(b)
        flat += [wp.astype(jnp.bfloat16), bp]
        in_p = fo_p
    w5, b5 = params[-1]                          # [25, 1], [1, 1]
    k = w5.shape[0]
    w5_row = jnp.zeros((1, in_p), jnp.float32).at[0, :k].set(w5[:, 0])
    flat += [w5_row, jnp.asarray(b5, jnp.float32).reshape(1, 1)]
    return flat


@functools.partial(jax.jit, static_argnames=("tile_b",))
def mlp_forward(x, flat_params, *, tile_b=512):
    B, D = x.shape
    assert D == DIMS[0]

    # Adapt tile to small batches; keep it a multiple of 16 (bf16 sublanes).
    tile_b = min(tile_b, _round_up(B, 16))
    assert tile_b % 8 == 0
    Bp = _round_up(B, tile_b)

    xb = x.astype(jnp.bfloat16)                  # halve x HBM traffic
    if Bp != B:
        xb = jnp.pad(xb, ((0, Bp - B), (0, 0)))

    # Params are tiny and grid-invariant: constant index_map keeps them
    # resident in VMEM across all grid steps (fetched once).
    param_specs = [pl.BlockSpec(p.shape, lambda i: (0, 0)) for p in flat_params]

    grid = (Bp // tile_b,)
    out = pl.pallas_call(
        mlp_kernel,
        out_shape=jax.ShapeDtypeStruct((Bp, DIMS[-1]), jnp.float32),
        grid_spec=pltpu.PrefetchScalarGridSpec(
            num_scalar_prefetch=0,
            grid=grid,
            in_specs=[pl.BlockSpec((tile_b, D), lambda i: (i, 0))] + param_specs,
            out_specs=pl.BlockSpec((tile_b, DIMS[-1]), lambda i: (i, 0)),
        ),
        compiler_params=pltpu.CompilerParams(
            dimension_semantics=("parallel",)),
    )(xb, *flat_params)
    return out[:B]


# ----------------------------------------------------------------------------
# Reference / init
# ----------------------------------------------------------------------------
def init_params(key):
    """PyTorch nn.Linear-style init: U[-1/sqrt(fan_in), +1/sqrt(fan_in)]."""
    params = []
    for i in range(len(DIMS) - 1):
        fan_in, fan_out = DIMS[i], DIMS[i + 1]
        key, kw, kb = jax.random.split(key, 3)
        bound = 1.0 / jnp.sqrt(fan_in)
        w = jax.random.uniform(kw, (fan_in, fan_out), jnp.float32, -bound, bound)
        b = jax.random.uniform(kb, (1, fan_out), jnp.float32, -bound, bound)
        params.append((w, b))
    return params


def mlp_reference_f32(x, params):
    """Exact module semantics in f32."""
    h = x
    for i, (w, b) in enumerate(params):
        h = h @ w + b
        if i < len(params) - 1:
            h = jnp.maximum(h, 0.0)
    return h


def mlp_reference_bf16(x, params):
    """Numerically emulates the kernel: bf16 matmul inputs, f32 accumulate,
    bias/ReLU in f32, final layer fully in f32."""
    h = x.astype(jnp.bfloat16)
    n_relu = len(params) - 1
    for i, (w, b) in enumerate(params[:-1]):
        h = jnp.dot(h, w.astype(jnp.bfloat16),
                    preferred_element_type=jnp.float32) + b
        h = jnp.maximum(h, 0.0)
        if i < n_relu - 1:
            h = h.astype(jnp.bfloat16)
    w5, b5 = params[-1]
    return h @ w5 + b5


if __name__ == "__main__":
    key = jax.random.PRNGKey(0)
    key, kx = jax.random.split(key)
    B = 64
    x = jax.random.normal(kx, (B, INPUT_DIM), jnp.float32)
    params = init_params(key)
    flat_params = prepare_params(params)

    out = mlp_forward(x, flat_params)
    out = jax.block_until_ready(out)
    assert out.shape == (B, 1), out.shape

    # Tight check: kernel vs. a plain-JAX emulation of the same bf16/f32 math.
    ref_bf16 = mlp_reference_bf16(x, params)
    assert jnp.allclose(out, ref_bf16, atol=1e-3, rtol=1e-3), \
        float(jnp.max(jnp.abs(out - ref_bf16)))

    # Semantic check: kernel vs. the original f32 module, bf16-level tolerance.
    ref_f32 = mlp_reference_f32(x, params)
    assert jnp.allclose(out, ref_f32, atol=2e-2, rtol=2e-2), \
        float(jnp.max(jnp.abs(out - ref_f32)))

    print("KERNEL_OK")
</pallas_src>

<mosaic_0001>
module attributes {stable_mosaic.version = 11 : i64} {
  func.func @mlp_kernel(%arg0: i32, %arg1: memref<64x64xbf16, #tpu.memory_space<vmem>>, %arg2: memref<64x256xbf16, #tpu.memory_space<vmem>>, %arg3: memref<1x256xf32, #tpu.memory_space<vmem>>, %arg4: memref<256x256xbf16, #tpu.memory_space<vmem>>, %arg5: memref<1x256xf32, #tpu.memory_space<vmem>>, %arg6: memref<256x128xbf16, #tpu.memory_space<vmem>>, %arg7: memref<1x128xf32, #tpu.memory_space<vmem>>, %arg8: memref<128x128xbf16, #tpu.memory_space<vmem>>, %arg9: memref<1x128xf32, #tpu.memory_space<vmem>>, %arg10: memref<1x128xf32, #tpu.memory_space<vmem>>, %arg11: memref<1x1xf32, #tpu.memory_space<vmem>>, %arg12: memref<64x1xf32, #tpu.memory_space<vmem>>) attributes {dimension_semantics = [#tpu.dimension_semantics<parallel>], iteration_bounds = array<i64: 1>, scalar_prefetch = 0 : i64, scratch_operands = 0 : i64, tpu.core_type = #tpu.core_type<tc>, window_params = [{transform_indices = @transform_0, window_bounds = array<i64: 64, 64>}, {pipeline_mode = #tpu.pipeline_mode<synchronous>, transform_indices = @transform_1, window_bounds = array<i64: 64, 256>}, {pipeline_mode = #tpu.pipeline_mode<synchronous>, transform_indices = @transform_2, window_bounds = array<i64: 1, 256>}, {pipeline_mode = #tpu.pipeline_mode<synchronous>, transform_indices = @transform_3, window_bounds = array<i64: 256, 256>}, {pipeline_mode = #tpu.pipeline_mode<synchronous>, transform_indices = @transform_4, window_bounds = array<i64: 1, 256>}, {pipeline_mode = #tpu.pipeline_mode<synchronous>, transform_indices = @transform_5, window_bounds = array<i64: 256, 128>}, {pipeline_mode = #tpu.pipeline_mode<synchronous>, transform_indices = @transform_6, window_bounds = array<i64: 1, 128>}, {pipeline_mode = #tpu.pipeline_mode<synchronous>, transform_indices = @transform_7, window_bounds = array<i64: 128, 128>}, {pipeline_mode = #tpu.pipeline_mode<synchronous>, transform_indices = @transform_8, window_bounds = array<i64: 1, 128>}, {pipeline_mode = #tpu.pipeline_mode<synchronous>, transform_indices = @transform_9, window_bounds = array<i64: 1, 128>}, {pipeline_mode = #tpu.pipeline_mode<synchronous>, transform_indices = @transform_10, window_bounds = array<i64: 1, 1>}, {transform_indices = @transform_11, window_bounds = array<i64: 64, 1>}]} {
    %c0 = arith.constant 0 : index
    %c0_0 = arith.constant 0 : index
    %0 = vector.load %arg1[%c0, %c0_0] : memref<64x64xbf16, #tpu.memory_space<vmem>>, vector<64x64xbf16>
    %c0_1 = arith.constant 0 : index
    %c0_2 = arith.constant 0 : index
    %1 = vector.load %arg2[%c0_1, %c0_2] : memref<64x256xbf16, #tpu.memory_space<vmem>>, vector<64x256xbf16>
    %cst = arith.constant dense<0.000000e+00> : vector<64x256xf32>
    %2 = tpu.matmul %0, %1, %cst {dimension_numbers = #tpu.dot_dimension_numbers<[1], [0], [0], [1], [0, 0, 1, 1], [], []>} : vector<64x64xbf16>, vector<64x256xbf16>, vector<64x256xf32> -> vector<64x256xf32>
    %c0_3 = arith.constant 0 : index
    %c0_4 = arith.constant 0 : index
    %3 = vector.load %arg3[%c0_3, %c0_4] : memref<1x256xf32, #tpu.memory_space<vmem>>, vector<1x256xf32>
    %4 = vector.broadcast %3 : vector<1x256xf32> to vector<64x256xf32>
    %5 = arith.addf %2, %4 : vector<64x256xf32>
    %cst_5 = arith.constant 0.000000e+00 : f32
    %6 = vector.broadcast %cst_5 : f32 to vector<64x256xf32>
    %7 = arith.maximumf %5, %6 : vector<64x256xf32>
    %8 = arith.truncf %7 : vector<64x256xf32> to vector<64x256xbf16>
    %c0_6 = arith.constant 0 : index
    %c0_7 = arith.constant 0 : index
    %9 = vector.load %arg4[%c0_6, %c0_7] : memref<256x256xbf16, #tpu.memory_space<vmem>>, vector<256x256xbf16>
    %cst_8 = arith.constant dense<0.000000e+00> : vector<64x256xf32>
    %10 = tpu.matmul %8, %9, %cst_8 {dimension_numbers = #tpu.dot_dimension_numbers<[1], [0], [0], [1], [0, 0, 1, 1], [], []>} : vector<64x256xbf16>, vector<256x256xbf16>, vector<64x256xf32> -> vector<64x256xf32>
    %c0_9 = arith.constant 0 : index
    %c0_10 = arith.constant 0 : index
    %11 = vector.load %arg5[%c0_9, %c0_10] : memref<1x256xf32, #tpu.memory_space<vmem>>, vector<1x256xf32>
    %12 = vector.broadcast %11 : vector<1x256xf32> to vector<64x256xf32>
    %13 = arith.addf %10, %12 : vector<64x256xf32>
    %cst_11 = arith.constant 0.000000e+00 : f32
    %14 = vector.broadcast %cst_11 : f32 to vector<64x256xf32>
    %15 = arith.maximumf %13, %14 : vector<64x256xf32>
    %16 = arith.truncf %15 : vector<64x256xf32> to vector<64x256xbf16>
    %c0_12 = arith.constant 0 : index
    %c0_13 = arith.constant 0 : index
    %17 = vector.load %arg6[%c0_12, %c0_13] : memref<256x128xbf16, #tpu.memory_space<vmem>>, vector<256x128xbf16>
    %cst_14 = arith.constant dense<0.000000e+00> : vector<64x128xf32>
    %18 = tpu.matmul %16, %17, %cst_14 {dimension_numbers = #tpu.dot_dimension_numbers<[1], [0], [0], [1], [0, 0, 1, 1], [], []>} : vector<64x256xbf16>, vector<256x128xbf16>, vector<64x128xf32> -> vector<64x128xf32>
    %c0_15 = arith.constant 0 : index
    %c0_16 = arith.constant 0 : index
    %19 = vector.load %arg7[%c0_15, %c0_16] : memref<1x128xf32, #tpu.memory_space<vmem>>, vector<1x128xf32>
    %20 = vector.broadcast %19 : vector<1x128xf32> to vector<64x128xf32>
    %21 = arith.addf %18, %20 : vector<64x128xf32>
    %cst_17 = arith.constant 0.000000e+00 : f32
    %22 = vector.broadcast %cst_17 : f32 to vector<64x128xf32>
    %23 = arith.maximumf %21, %22 : vector<64x128xf32>
    %24 = arith.truncf %23 : vector<64x128xf32> to vector<64x128xbf16>
    %c0_18 = arith.constant 0 : index
    %c0_19 = arith.constant 0 : index
    %25 = vector.load %arg8[%c0_18, %c0_19] : memref<128x128xbf16, #tpu.memory_space<vmem>>, vector<128x128xbf16>
    %cst_20 = arith.constant dense<0.000000e+00> : vector<64x128xf32>
    %26 = tpu.matmul %24, %25, %cst_20 {dimension_numbers = #tpu.dot_dimension_numbers<[1], [0], [0], [1], [0, 0, 1, 1], [], []>} : vector<64x128xbf16>, vector<128x128xbf16>, vector<64x128xf32> -> vector<64x128xf32>
    %c0_21 = arith.constant 0 : index
    %c0_22 = arith.constant 0 : index
    %27 = vector.load %arg9[%c0_21, %c0_22] : memref<1x128xf32, #tpu.memory_space<vmem>>, vector<1x128xf32>
    %28 = vector.broadcast %27 : vector<1x128xf32> to vector<64x128xf32>
    %29 = arith.addf %26, %28 : vector<64x128xf32>
    %cst_23 = arith.constant 0.000000e+00 : f32
    %30 = vector.broadcast %cst_23 : f32 to vector<64x128xf32>
    %31 = arith.maximumf %29, %30 : vector<64x128xf32>
    %c0_24 = arith.constant 0 : index
    %c0_25 = arith.constant 0 : index
    %32 = vector.load %arg10[%c0_24, %c0_25] : memref<1x128xf32, #tpu.memory_space<vmem>>, vector<1x128xf32>
    %33 = vector.broadcast %32 : vector<1x128xf32> to vector<64x128xf32>
    %34 = arith.mulf %31, %33 : vector<64x128xf32>
    %cst_26 = arith.constant dense<0.000000e+00> : vector<64xf32>
    %35 = vector.multi_reduction <add>, %34, %cst_26 [1] : vector<64x128xf32> to vector<64xf32>
    %36 = vector.shape_cast %35 : vector<64xf32> to vector<64x1xf32>
    %c0_27 = arith.constant 0 : index
    %c0_28 = arith.constant 0 : index
    %37 = vector.load %arg11[%c0_27, %c0_28] : memref<1x1xf32, #tpu.memory_space<vmem>>, vector<1x1xf32>
    %38 = vector.broadcast %37 : vector<1x1xf32> to vector<64x1xf32>
    %39 = arith.addf %36, %38 : vector<64x1xf32>
    %c0_29 = arith.constant 0 : index
    %c0_30 = arith.constant 0 : index
    %40 = vector.load %arg12[%c0_29, %c0_30] : memref<64x1xf32, #tpu.memory_space<vmem>>, vector<64x1xf32>
    tpu.vector_store %arg12[%c0_29, %c0_30], %39 {strides = array<i32>} : memref<64x1xf32, #tpu.memory_space<vmem>>, vector<64x1xf32>,
    return
  }
  func.func @transform_0(%arg0: i32) -> (i32, i32) {
    %c0_i32 = arith.constant 0 : i32
    %c0_i32_0 = arith.constant 0 : i32
    return %arg0, %c0_i32 : i32, i32
  }
  func.func @transform_1(%arg0: i32) -> (i32, i32) {
    %c0_i32 = arith.constant 0 : i32
    %c0_i32_0 = arith.constant 0 : i32
    %c0_i32_1 = arith.constant 0 : i32
    return %c0_i32, %c0_i32_0 : i32, i32
  }
  func.func @transform_2(%arg0: i32) -> (i32, i32) {
    %c0_i32 = arith.constant 0 : i32
    %c0_i32_0 = arith.constant 0 : i32
    %c0_i32_1 = arith.constant 0 : i32
    return %c0_i32, %c0_i32_0 : i32, i32
  }
  func.func @transform_3(%arg0: i32) -> (i32, i32) {
    %c0_i32 = arith.constant 0 : i32
    %c0_i32_0 = arith.constant 0 : i32
    %c0_i32_1 = arith.constant 0 : i32
    return %c0_i32, %c0_i32_0 : i32, i32
  }
  func.func @transform_4(%arg0: i32) -> (i32, i32) {
    %c0_i32 = arith.constant 0 : i32
    %c0_i32_0 = arith.constant 0 : i32
    %c0_i32_1 = arith.constant 0 : i32
    return %c0_i32, %c0_i32_0 : i32, i32
  }
  func.func @transform_5(%arg0: i32) -> (i32, i32) {
    %c0_i32 = arith.constant 0 : i32
    %c0_i32_0 = arith.constant 0 : i32
    %c0_i32_1 = arith.constant 0 : i32
    return %c0_i32, %c0_i32_0 : i32, i32
  }
  func.func @transform_6(%arg0: i32) -> (i32, i32) {
    %c0_i32 = arith.constant 0 : i32
    %c0_i32_0 = arith.constant 0 : i32
    %c0_i32_1 = arith.constant 0 : i32
    return %c0_i32, %c0_i32_0 : i32, i32
  }
  func.func @transform_7(%arg0: i32) -> (i32, i32) {
    %c0_i32 = arith.constant 0 : i32
    %c0_i32_0 = arith.constant 0 : i32
    %c0_i32_1 = arith.constant 0 : i32
    return %c0_i32, %c0_i32_0 : i32, i32
  }
  func.func @transform_8(%arg0: i32) -> (i32, i32) {
    %c0_i32 = arith.constant 0 : i32
    %c0_i32_0 = arith.constant 0 : i32
    %c0_i32_1 = arith.constant 0 : i32
    return %c0_i32, %c0_i32_0 : i32, i32
  }
  func.func @transform_9(%arg0: i32) -> (i32, i32) {
    %c0_i32 = arith.constant 0 : i32
    %c0_i32_0 = arith.constant 0 : i32
    %c0_i32_1 = arith.constant 0 : i32
    return %c0_i32, %c0_i32_0 : i32, i32
  }
  func.func @transform_10(%arg0: i32) -> (i32, i32) {
    %c0_i32 = arith.constant 0 : i32
    %c0_i32_0 = arith.constant 0 : i32
    %c0_i32_1 = arith.constant 0 : i32
    return %c0_i32, %c0_i32_0 : i32, i32
  }
  func.func @transform_11(%arg0: i32) -> (i32, i32) {
    %c0_i32 = arith.constant 0 : i32
    %c0_i32_0 = arith.constant 0 : i32
    return %arg0, %c0_i32 : i32, i32
  }
}

</mosaic_0001>

<bundles_post_ra>
// kernel: mlp_forward.1
= control target key start
LH: loop header
LB: loop body
LE: loop exit
PB: predicated region body
PF: predicated region fallthrough
CT: control target
= control target key end

     0   :  { %s1538_s0 = inlined_call_operand.vmem [shape: bf16[64,64], index: 0, kind: input, shape index: {}]   ;;  %s1539_s1 = inlined_call_operand.vmem [shape: bf16[64,256], index: 1, kind: input, shape index: {}]   ;;  %s1540_s2 = inlined_call_operand.vmem [shape: f32[1,256], index: 2, kind: input, shape index: {}]   ;;  %s1541_s3 = inlined_call_operand.hbm [shape: bf16[256,256], index: 3, kind: input, shape index: {}]   ;;  %s1542_s4 = inlined_call_operand.vmem [shape: f32[1,256], index: 4, kind: input, shape index: {}]   ;;  %s1543_s5 = inlined_call_operand.hbm [shape: bf16[256,128], index: 5, kind: input, shape index: {}]   ;;  %s1544_s6 = inlined_call_operand.vmem [shape: f32[1,128], index: 6, kind: input, shape index: {}]   ;;  %s1545_s7 = inlined_call_operand.hbm [shape: bf16[128,128], index: 7, kind: input, shape index: {}]   ;;  %s1546_s8 = inlined_call_operand.vmem [shape: f32[1,128], index: 8, kind: input, shape index: {}]   ;;  %s1547_s9 = inlined_call_operand.vmem [shape: f32[1,128], index: 9, kind: input, shape index: {}]   ;;  %s1548_s10 = inlined_call_operand.<no memory space> [shape: f32[1,1], index: 10, kind: input, shape index: {}]   ;;  %s1549_s11 = inlined_call_operand.vmem [shape: f32[64,1], index: 11, kind: output, shape index: {}]  }
   0x1   :  { %v16_v0 = vstv %s1548_s10 }
   0x2   :  { %17 = vst [vmem:[#allocation2] sm:$0x1] %v16_v0 }
   0x3   :  { %18 = vsyncpa [#allocation4], 0 }
   0x4   :  { %19 = vsyncpa [#allocation6], 0  ;;  %s1316_s19 = smov [#allocation5]   ;;  %s1246_s23 = scalar_lea.hbm %s1543_s5, 2048 }
   0x5   :  { %s45_s20 = sshll.u32 %s1316_s19, 4  ;;  %p1247_p0 = scmp.ne.s32.totalorder %s1543_s5, %s1246_s23  ;;  %s46_s20 = int_to_ptr.vmem [resolvable:$true] %s45_s20 }
   0x6   :  { %p1250_p1 = scmp.lt.u32.totalorder %s1246_s23, %s1543_s5 }
   0x8   :  { %p1252_p2 = pnand %p1250_p1, %p1247_p0 }
   0xa   :  { %1255 = shalt.err (!%p1252_p2)
}
   0xb   :  { %s1256_s10 = scalar_lea.vmem %s46_s20, 2048  ;;  %p1261_p4 = scmp.lt.s32.totalorder %s46_s20, %s46_s20 }
   0xc   :  { %p1257_p3 = scmp.ne.s32.totalorder %s46_s20, %s1256_s10  ;;  %p1262_p5 = scmp.lt.s32.totalorder %s1256_s10, %s1256_s10 }
   0xe   :  { %p1263_p6 = por %p1262_p5, %p1261_p4 }
  0x10   :  { %p1264_p7 = pnand %p1263_p6, %p1257_p3 }
  0x12   :  { %1267 = shalt.err (!%p1264_p7)
}
  0x13   :  { %s1317_s28 = smov 64   ;;  %s1318_s29 = smov 4  }
  0x14   :  { %51 = dma.hbm_to_vmem [thread:$0]  %s1543_s5, 2048, %s46_s20, [#allocation6], %s1317_s28, %s1317_s28, %s1318_s29  }
  0x15   :  { %s1319_s13 = smov [#allocation3]   ;;  %s1268_s17 = scalar_lea.hbm %s1541_s3, 4096 }
  0x16   :  { %s31_s14 = sshll.u32 %s1319_s13, 4  ;;  %p1269_p8 = scmp.ne.s32.totalorder %s1541_s3, %s1268_s17  ;;  %s32_s14 = int_to_ptr.vmem [resolvable:$true] %s31_s14 }
  0x17   :  { %p1272_p9 = scmp.lt.u32.totalorder %s1268_s17, %s1541_s3 }
  0x19   :  { %p1274_p10 = pnand %p1272_p9, %p1269_p8 }
  0x1b   :  { %1277 = shalt.err (!%p1274_p10)
}
  0x1c   :  { %s1278_s23 = scalar_lea.vmem %s32_s14, 4096  ;;  %p1283_p12 = scmp.lt.s32.totalorder %s32_s14, %s32_s14 }
  0x1d   :  { %p1279_p11 = scmp.ne.s32.totalorder %s32_s14, %s1278_s23  ;;  %p1284_p13 = scmp.lt.s32.totalorder %s1278_s23, %s1278_s23 }
  0x1f   :  { %p1285_p0 = por %p1284_p13, %p1283_p12 }
  0x21   :  { %p1286_p1 = pnand %p1285_p0, %p1279_p11 }
  0x23   :  { %1289 = shalt.err (!%p1286_p1)
}
  0x24   :  { %s1320_s5 = smov 128   ;;  %s1321_s20 = smov 8  }
  0x25   :  { %37 = dma.hbm_to_vmem [thread:$0]  %s1541_s3, 4096, %s32_s14, [#allocation4], %s1320_s5, %s1320_s5, %s1321_s20  }
  0x26   :  { %s1322_s26 = smov [#allocation7]   ;;  %s1290_s12 = scalar_lea.hbm %s1545_s7, 1024 }
  0x27   :  { %s59_s27 = sshll.u32 %s1322_s26, 4  ;;  %p1291_p2 = scmp.ne.s32.totalorder %s1545_s7, %s1290_s12  ;;  %s60_s27 = int_to_ptr.vmem [resolvable:$true] %s59_s27 }
  0x28   :  { %p1294_p3 = scmp.lt.u32.totalorder %s1290_s12, %s1545_s7 }
  0x2a   :  { %p1296_p4 = pnand %p1294_p3, %p1291_p2 }
  0x2c   :  { %1299 = shalt.err (!%p1296_p4)
}
  0x2d   :  { %s1300_s18 = scalar_lea.vmem %s60_s27, 1024  ;;  %p1305_p6 = scmp.lt.s32.totalorder %s60_s27, %s60_s27 }
  0x2e   :  { %p1301_p5 = scmp.ne.s32.totalorder %s60_s27, %s1300_s18  ;;  %p1306_p7 = scmp.lt.s32.totalorder %s1300_s18, %s1300_s18 }
  0x30   :  { %p1307_p8 = por %p1306_p7, %p1305_p6 }
  0x32   :  { %p1308_p9 = pnand %p1307_p8, %p1301_p5 }
  0x34   :  { %1311 = shalt.err (!%p1308_p9)
}
  0x35   :  { %65 = dma.hbm_to_vmem [thread:$0]  %s1545_s7, 1024, %s60_s27, [#allocation6], %s1317_s28, %s1317_s28, %s1318_s29  }
  0x36   :  { %1312 = dma.done.wait [#allocation4], 4096  }
  0x37   :  { %1313 = vsyncadd [#allocation4], 4294963200 }
  0x38   :  { %1314 = dma.done.wait [#allocation6], 3072  }
  0x39   :  { %1315 = vsyncadd [#allocation6], 4294964224  ;;  %v1323_v1 = vmov 0   ;;  %v1158_v2 = vld [vmem:[%s1539_s1 + $0x4] ss:$8 sps:$4 sm:$0xff]   ;;  %vm170_vm0 = vcmask 523264   ;;  %v100_v58 = vlaneseq }
  0x3a   :  { %215 = vmatprep.mubr.bf16.mxu0 %v1323_v1  ;;  %v1160_v3 = vld [vmem:[%s1539_s1] ss:$8 sps:$4 sm:$0xff]   ;;  %183 = vmatprep.subr.bf16.mxu0 %v1158_v2  ;;  %v1161_v4 = vld [vmem:[%s1539_s1 + $0x14] ss:$8 sps:$4 sm:$0xff]   ;;  %v1163_v5 = vld [vmem:[%s1539_s1 + $0x10] ss:$8 sps:$4 sm:$0xff]  }
  0x3b   :  { %184 = vmatpush1.bf16.msra.mxu0 %v1160_v3  ;;  %v1164_v6 = vld [vmem:[%s1539_s1 + $0x24] ss:$8 sps:$4 sm:$0xff]   ;;  %v1166_v7 = vld [vmem:[%s1539_s1 + $0x20] ss:$8 sps:$4 sm:$0xff]   ;;  %v1167_v8 = vld [vmem:[%s1539_s1 + $0x34] ss:$8 sps:$4 sm:$0xff]  }
  0x3c   :  { %185 = vmatprep.subr.bf16.mxu0 %v1161_v4  ;;  %v1174_v9 = vld [vmem:[#allocation3 + $0x4] ss:$8 sps:$4 sm:$0xff]   ;;  %v1176_v10 = vld [vmem:[#allocation3] ss:$8 sps:$4 sm:$0xff]   ;;  %v1177_v12 = vld [vmem:[#allocation3 + $0x14] ss:$8 sps:$4 sm:$0xff]  }
  0x3d   :  { %v1169_v11 = vld [vmem:[%s1539_s1 + $0x30] ss:$8 sps:$4 sm:$0xff]   ;;  %484 = vmatprep.subr.bf16.mxu1 %v1174_v9  ;;  %v1170_v14 = vld [vmem:[%s1538_s0] sm:$0xff]   ;;  %v1171_v19 = vld [vmem:[%s1538_s0 + $0x8] sm:$0xff]   ;;  %v1469_v59 = vshrl.u32 %v100_v58, 7  ;;  %vm983_vm1 = vcmask 7168  }
  0x3e   :  { %485 = vmatpush1.bf16.msra.mxu1 %v1176_v10  ;;  %v1179_v13 = vld [vmem:[#allocation3 + $0x10] ss:$8 sps:$4 sm:$0xff]   ;;  %v1180_v15 = vld [vmem:[#allocation3 + $0x24] ss:$8 sps:$4 sm:$0xff]   ;;  %v1182_v16 = vld [vmem:[#allocation3 + $0x20] ss:$8 sps:$4 sm:$0xff]  }
  0x3f   :  { %186 = vmatpush1.bf16.msra.mxu0 %v1163_v5  ;;  %486 = vmatprep.subr.bf16.mxu1 %v1177_v12  ;;  %v1183_v17 = vld [vmem:[#allocation3 + $0x34] ss:$8 sps:$4 sm:$0xff]   ;;  %v1185_v18 = vld [vmem:[#allocation3 + $0x30] ss:$8 sps:$4 sm:$0xff]   ;;  %v1186_v20 = vld [vmem:[#allocation3 + $0x44] ss:$8 sps:$4 sm:$0xff]  }
  0x40   :  { %187 = vmatprep.subr.bf16.mxu0 %v1164_v6  ;;  %v1188_v21 = vld [vmem:[#allocation3 + $0x40] ss:$8 sps:$4 sm:$0xff]   ;;  %v1189_v22 = vld [vmem:[#allocation3 + $0x54] ss:$8 sps:$4 sm:$0xff]   ;;  %v1191_v23 = vld [vmem:[#allocation3 + $0x50] ss:$8 sps:$4 sm:$0xff]  }
  0x41   :  { %v1172_v24 = vld [vmem:[%s1538_s0 + $0x10] sm:$0xff]   ;;  %v1194_v26 = vld [vmem:[#allocation3 + $0x60] ss:$8 sps:$4 sm:$0xff]   ;;  %v1173_v29 = vld [vmem:[%s1538_s0 + $0x18] sm:$0xff]   ;;  %v102_v60 = vsub.s32 0, %v1469_v59  ;;  %v106_v62 = vsub.s32 1, %v1469_v59 }
  0x42   :  { %487 = vmatpush1.bf16.msra.mxu1 %v1179_v13  ;;  %v1192_v25 = vld [vmem:[#allocation3 + $0x64] ss:$8 sps:$4 sm:$0xff]   ;;  %v1195_v27 = vld [vmem:[#allocation3 + $0x74] ss:$8 sps:$4 sm:$0xff]   ;;  %v1197_v28 = vld [vmem:[#allocation3 + $0x70] ss:$8 sps:$4 sm:$0xff]  }
  0x43   :  { %188 = vmatpush1.bf16.msra.mxu0 %v1166_v7  ;;  %488 = vmatprep.subr.bf16.mxu1 %v1180_v15  ;;  %v1198_v30 = vld [vmem:[#allocation3 + $0x84] ss:$8 sps:$4 sm:$0xff]   ;;  %v1200_v31 = vld [vmem:[#allocation3 + $0x80] ss:$8 sps:$4 sm:$0xff]   ;;  %v1201_v32 = vld [vmem:[#allocation3 + $0x94] ss:$8 sps:$4 sm:$0xff]  }
  0x44   :  { %189 = vmatprep.subr.bf16.mxu0 %v1167_v8  ;;  %v1203_v33 = vld [vmem:[#allocation3 + $0x90] ss:$8 sps:$4 sm:$0xff]   ;;  %v1204_v34 = vld [vmem:[#allocation3 + $0xa4] ss:$8 sps:$4 sm:$0xff]   ;;  %v1206_v35 = vld [vmem:[#allocation3 + $0xa0] ss:$8 sps:$4 sm:$0xff]  }
  0x45   :  { %v1207_v36 = vld [vmem:[#allocation3 + $0xb4] ss:$8 sps:$4 sm:$0xff]   ;;  %v1209_v37 = vld [vmem:[#allocation3 + $0xb0] ss:$8 sps:$4 sm:$0xff]   ;;  %v1210_v38 = vld [vmem:[#allocation3 + $0xc4] ss:$8 sps:$4 sm:$0xff]  }
  0x46   :  { %489 = vmatpush1.bf16.msra.mxu1 %v1182_v16  ;;  %v1212_v39 = vld [vmem:[#allocation3 + $0xc0] ss:$8 sps:$4 sm:$0xff]   ;;  %v1213_v40 = vld [vmem:[#allocation3 + $0xd4] ss:$8 sps:$4 sm:$0xff]   ;;  %v1215_v41 = vld [vmem:[#allocation3 + $0xd0] ss:$8 sps:$4 sm:$0xff]  }
  0x47   :  { %190 = vmatpush1.bf16.msra.mxu0 %v1169_v11  ;;  %490 = vmatprep.subr.bf16.mxu1 %v1183_v17  ;;  %v1216_v42 = vld [vmem:[#allocation3 + $0xe4] ss:$8 sps:$4 sm:$0xff]   ;;  %v1218_v43 = vld [vmem:[#allocation3 + $0xe0] ss:$8 sps:$4 sm:$0xff]   ;;  %v1219_v44 = vld [vmem:[#allocation3 + $0xf4] ss:$8 sps:$4 sm:$0xff]  }
  0x48   :  { %v1221_v45 = vld [vmem:[#allocation3 + $0xf0] ss:$8 sps:$4 sm:$0xff]   ;;  %v1222_v46 = vld [vmem:[#allocation5 + $0x40] sm:$0xff]   ;;  %v1224_v48 = vld [vmem:[#allocation5 + $0x48] sm:$0xff]  }
  0x49   :  { %v1223_v47 = vld [vmem:[#allocation5] sm:$0xff]   ;;  %1074 = vmatprep.subr.bf16.mxu0 %v1222_v46  ;;  %v1225_v49 = vld [vmem:[#allocation5 + $0x8] sm:$0xff]   ;;  %v1226_v50 = vld [vmem:[#allocation5 + $0x50] sm:$0xff]  }
  0x4a   :  { %1010 = vmatmul.mubr.msk.bf16.vlgmr.msra.gmra.mrb[0].mxu0 %vm170_vm0, %v1170_v14  ;;  %491 = vmatpush1.bf16.msra.mxu1 %v1185_v18  ;;  %v1227_v51 = vld [vmem:[#allocation5 + $0x10] sm:$0xff]   ;;  %v1228_v52 = vld [vmem:[#allocation5 + $0x58] sm:$0xff]   ;;  %v1230_v54 = vld [vmem:[#allocation5 + $0x60] sm:$0xff]  }
  0x4b   :  { %225 = vmatprep.mubr.bf16.mxu0 %v1323_v1  ;;  %492 = vmatprep.subr.bf16.mxu1 %v1186_v20  ;;  %v1229_v53 = vld [vmem:[#allocation5 + $0x18] sm:$0xff]   ;;  %v1231_v55 = vld [vmem:[#allocation5 + $0x20] sm:$0xff]   ;;  %v1232_v56 = vld [vmem:[#allocation5 + $0x68] sm:$0xff]  }
  0x4c   :  { %1075 = vmatpush3.bf16.msra.mxu0 %v1223_v47  ;;  %v1233_v57 = vld [vmem:[#allocation5 + $0x28] sm:$0xff]   ;;  %v98_v61 = vld [vmem:[%s1540_s2] sm:$0x3]  ;;  %v1235_v58 = vld [vmem:[#allocation5 + $0x30] sm:$0xff]  }
  0x4d   :  { %1076 = vmatprep.subr.bf16.mxu0 %v1224_v48  ;;  %v103_v63 = vrot.slane %v98_v61, %v102_v60  ;;  %v107_v0 = vrot.slane %v98_v61, %v106_v62  ;;  %v1236_v61 = vld [vmem:[#allocation5 + $0x78] sm:$0xff]  }
  0x4e   :  { %493 = vmatpush1.bf16.msra.mxu1 %v1188_v21 }
  0x4f   :  { %494 = vmatprep.subr.bf16.mxu1 %v1189_v22 }
  0x50   :  { %1077 = vmatpush3.bf16.msra.mxu0 %v1225_v49 }
  0x51   :  { %1078 = vmatprep.subr.bf16.mxu0 %v1226_v50 }
  0x52   :  { %1011 = vmatmul.mubr.msk.bf16.gmra.mrb[4].mxu0 %vm170_vm0, %v1171_v19  ;;  %495 = vmatpush1.bf16.msra.mxu1 %v1191_v23 }
  0x53   :  { %235 = vmatprep.mubr.bf16.mxu0 %v1323_v1  ;;  %496 = vmatprep.subr.bf16.mxu1 %v1192_v25 }
  0x54   :  { %1079 = vmatpush3.bf16.msra.mxu0 %v1227_v51 }
  0x55   :  { %1080 = vmatprep.subr.bf16.mxu0 %v1228_v52 }
  0x56   :  { %497 = vmatpush1.bf16.msra.mxu1 %v1194_v26 }
  0x57   :  { %498 = vmatprep.subr.bf16.mxu1 %v1195_v27 }
  0x58   :  { %1081 = vmatpush3.bf16.msra.mxu0 %v1229_v53 }
  0x59   :  { %1082 = vmatprep.subr.bf16.mxu0 %v1230_v54 }
  0x5a   :  { %1012 = vmatmul.mubr.msk.bf16.gmra.mrb[8].mxu0 %vm170_vm0, %v1172_v24  ;;  %499 = vmatpush1.bf16.msra.mxu1 %v1197_v28 }
  0x5b   :  { %245 = vmatprep.mubr.bf16.mxu0 %v1323_v1  ;;  %500 = vmatprep.subr.bf16.mxu1 %v1198_v30 }
  0x5c   :  { %1083 = vmatpush3.bf16.msra.mxu0 %v1231_v55 }
  0x5d   :  { %1084 = vmatprep.subr.bf16.mxu0 %v1232_v56 }
  0x5e   :  { %501 = vmatpush1.bf16.msra.mxu1 %v1200_v31 }
  0x5f   :  { %502 = vmatprep.subr.bf16.mxu1 %v1201_v32 }
  0x60   :  { %1085 = vmatpush3.bf16.msra.mxu0 %v1233_v57  ;;  %v1234_v57 = vld [vmem:[#allocation5 + $0x70] sm:$0xff]  }
  0x61   :  { %1086 = vmatprep.subr.bf16.mxu0 %v1234_v57 }
  0x62   :  { %1013 = vmatmul.mubr.msk.bf16.gmra.mrb[12].mxu0 %vm170_vm0, %v1173_v29  ;;  %503 = vmatpush1.bf16.msra.mxu1 %v1203_v33 }
  0x63   :  { %504 = vmatprep.subr.bf16.mxu1 %v1204_v34 }
  0x64   :  { %1087 = vmatpush3.bf16.msra.mxu0 %v1235_v58 }
  0x65   :  { %1088 = vmatprep.subr.bf16.mxu0 %v1236_v61  ;;  %v1241_v61 = vld [vmem:[#allocation7 + $0x18] sm:$0xff]  }
  0x66   :  { %505 = vmatpush1.bf16.msra.mxu1 %v1206_v35 }
  0x67   :  { %506 = vmatprep.subr.bf16.mxu1 %v1207_v36 }
  0x6a   :  { %507 = vmatpush1.bf16.msra.mxu1 %v1209_v37 }
  0x6b   :  { %508 = vmatprep.subr.bf16.mxu1 %v1210_v38 }
  0x6e   :  { %509 = vmatpush1.bf16.msra.mxu1 %v1212_v39 }
  0x6f   :  { %510 = vmatprep.subr.bf16.mxu1 %v1213_v40 }
  0x72   :  { %511 = vmatpush1.bf16.msra.mxu1 %v1215_v41 }
  0x73   :  { %512 = vmatprep.subr.bf16.mxu1 %v1216_v42 }
  0x76   :  { %513 = vmatpush1.bf16.msra.mxu1 %v1218_v43 }
  0x77   :  { %514 = vmatprep.subr.bf16.mxu1 %v1219_v44 }
  0x7a   :  { %515 = vmatpush1.bf16.msra.mxu1 %v1221_v45 }
 0x11d   :  { %v217_v1 = vpop.f32.mrb[0].mxu0 }
 0x11e   :  { %v218_v2 = vadd.f32 %v217_v1, %v103_v63  ;;  %v219_v3 = vpop.f32.mrb[1].mxu0  ;;  %v1237_v1 = vld [vmem:[#allocation5 + $0x38] sm:$0xff]  }
 0x11f   :  { %v220_v4 = vadd.f32 %v219_v3, %v107_v0  ;;  %v221_v5 = vpop.f32.mrb[2].mxu0  ;;  %1089 = vmatpush3.bf16.msra.mxu0 %v1237_v1  ;;  %v1242_v1 = vld [vmem:[#allocation7 + $0x20] sm:$0xff]  }
 0x120   :  { %v222_v6 = vadd.f32 %v221_v5, %v103_v63  ;;  %v223_v7 = vpop.f32.mrb[3].mxu0  ;;  %v256_v9 = vmax.f32 %v218_v2, 0.0 }
 0x121   :  { %v224_v8 = vadd.f32 %v223_v7, %v107_v0  ;;  %v257_v11 = vmax.f32 %v220_v4, 0.0 }
 0x122   :  { %v258_v10 = vmax.f32 %v222_v6, 0.0 }
 0x123   :  { %v259_v12 = vmax.f32 %v224_v8, 0.0 }
 0x124   :  { %v272_v13 = vpack.c.bf16 %v258_v10, %v256_v9 }
 0x125   :  { %v227_v14 = vpop.f32.mrb[4].mxu0  ;;  %v273_v15 = vpack.c.bf16 %v259_v12, %v257_v11 }
 0x126   :  { %v228_v16 = vadd.f32 %v227_v14, %v103_v63  ;;  %v229_v17 = vpop.f32.mrb[5].mxu0 }
 0x127   :  { %v230_v18 = vadd.f32 %v229_v17, %v107_v0  ;;  %v231_v19 = vpop.f32.mrb[6].mxu0  ;;  %516 = vmatprep.mubr.bf16.mxu1 %v273_v15 }
 0x128   :  { %v232_v20 = vadd.f32 %v231_v19, %v103_v63  ;;  %v233_v21 = vpop.f32.mrb[7].mxu0  ;;  %517 = vmatmul.mubr.bf16.vlgmr.msra.gmra.mrb[0].mxu1 %v272_v13  ;;  %v260_v23 = vmax.f32 %v228_v16, 0.0 }
 0x129   :  { %v234_v22 = vadd.f32 %v233_v21, %v107_v0  ;;  %v261_v25 = vmax.f32 %v230_v18, 0.0  ;;  %v1239_v18 = vld [vmem:[#allocation7 + $0x8] sm:$0xff]  }
 0x12a   :  { %v262_v24 = vmax.f32 %v232_v20, 0.0 }
 0x12b   :  { %v263_v26 = vmax.f32 %v234_v22, 0.0 }
 0x12c   :  { %v274_v27 = vpack.c.bf16 %v262_v24, %v260_v23 }
 0x12d   :  { %v275_v28 = vpack.c.bf16 %v263_v26, %v261_v25  ;;  %v237_v29 = vpop.f32.mrb[8].mxu0  ;;  %v1240_v26 = vld [vmem:[#allocation7 + $0x10] sm:$0xff]  }
 0x12e   :  { %v238_v30 = vadd.f32 %v237_v29, %v103_v63  ;;  %v239_v31 = vpop.f32.mrb[9].mxu0 }
 0x12f   :  { %v240_v32 = vadd.f32 %v239_v31, %v107_v0  ;;  %v241_v33 = vpop.f32.mrb[10].mxu0  ;;  %526 = vmatprep.mubr.bf16.mxu1 %v275_v28 }
 0x130   :  { %v242_v34 = vadd.f32 %v241_v33, %v103_v63  ;;  %v243_v35 = vpop.f32.mrb[11].mxu0  ;;  %527 = vmatmul.mubr.bf16.gmra.mrb[4].mxu1 %v274_v27  ;;  %v264_v37 = vmax.f32 %v238_v30, 0.0 }
 0x131   :  { %v244_v36 = vadd.f32 %v243_v35, %v107_v0  ;;  %v265_v39 = vmax.f32 %v240_v32, 0.0 }
 0x132   :  { %v266_v38 = vmax.f32 %v242_v34, 0.0 }
 0x133   :  { %v267_v40 = vmax.f32 %v244_v36, 0.0 }
 0x134   :  { %v276_v41 = vpack.c.bf16 %v266_v38, %v264_v37 }
 0x135   :  { %v277_v42 = vpack.c.bf16 %v267_v40, %v265_v39  ;;  %v247_v43 = vpop.f32.mrb[12].mxu0 }
 0x136   :  { %v248_v44 = vadd.f32 %v247_v43, %v103_v63  ;;  %v249_v45 = vpop.f32.mrb[13].mxu0 }
 0x137   :  { %v250_v46 = vadd.f32 %v249_v45, %v107_v0  ;;  %v251_v47 = vpop.f32.mrb[14].mxu0  ;;  %536 = vmatprep.mubr.bf16.mxu1 %v277_v42 }
 0x138   :  { %v252_v48 = vadd.f32 %v251_v47, %v103_v63  ;;  %v253_v49 = vpop.f32.mrb[15].mxu0  ;;  %537 = vmatmul.mubr.bf16.gmra.mrb[8].mxu1 %v276_v41  ;;  %v268_v51 = vmax.f32 %v248_v44, 0.0  ;;  %v1238_v63 = vld [vmem:[#allocation7] sm:$0xff]  }
 0x139   :  { %v254_v50 = vadd.f32 %v253_v49, %v107_v0  ;;  %v269_v53 = vmax.f32 %v250_v46, 0.0  ;;  %1126 = vmatprep.subr.bf16.mxu0 %v1238_v63  ;;  %v312_v0 = vld [vmem:[%s1542_s4] sm:$0x3] }
 0x13a   :  { %v270_v52 = vmax.f32 %v252_v48, 0.0  ;;  %v317_v2 = vrot.slane %v312_v0, %v102_v60  ;;  %v1487_v3 = vrot.slane %v312_v0, %v106_v62  ;;  %v1244_v0 = vld [vmem:[#allocation7 + $0x30] sm:$0xff]  }
 0x13b   :  { %v271_v54 = vmax.f32 %v254_v50, 0.0 }
 0x13c   :  { %v278_v55 = vpack.c.bf16 %v270_v52, %v268_v51 }
 0x13d   :  { %v279_v56 = vpack.c.bf16 %v271_v54, %v269_v53 }
 0x13f   :  { %546 = vmatprep.mubr.bf16.mxu1 %v279_v56 }
 0x140   :  { %547 = vmatmul.mubr.bf16.gmra.mrb[12].mxu1 %v278_v55 }
 0x1fb   :  { %v518_v4 = vpop.f32.mrb[0].mxu1 }
 0x1fc   :  { %v519_v5 = vadd.f32 %v518_v4, %v317_v2  ;;  %v520_v6 = vpop.f32.mrb[1].mxu1  ;;  %v1046_v4 = vld [vmem:[%s1544_s6] ss:$0 sm:$0xff] }
 0x1fd   :  { %v521_v7 = vadd.f32 %v520_v6, %v1487_v3  ;;  %v522_v8 = vpop.f32.mrb[2].mxu1 }
 0x1fe   :  { %v523_v9 = vadd.f32 %v522_v8, %v317_v2  ;;  %v524_v10 = vpop.f32.mrb[3].mxu1  ;;  %v557_v12 = vmax.f32 %v519_v5, 0.0 }
 0x1ff   :  { %v525_v11 = vadd.f32 %v524_v10, %v1487_v3  ;;  %v558_v14 = vmax.f32 %v521_v7, 0.0 }
 0x200   :  { %v559_v13 = vmax.f32 %v523_v9, 0.0 }
 0x201   :  { %v560_v15 = vmax.f32 %v525_v11, 0.0 }
 0x202   :  { %v573_v16 = vpack.c.bf16 %v559_v13, %v557_v12 }
 0x203   :  { %v574_v60 = vpack.c.bf16 %v560_v15, %v558_v14  ;;  %v528_v17 = vpop.f32.mrb[4].mxu1 }
 0x204   :  { %v529_v59 = vadd.f32 %v528_v17, %v317_v2  ;;  %v530_v62 = vpop.f32.mrb[5].mxu1 }
 0x205   :  { %v531_v19 = vadd.f32 %v530_v62, %v1487_v3  ;;  %v532_v20 = vpop.f32.mrb[6].mxu1  ;;  %748 = vmatprep.mubr.bf16.mxu0 %v574_v60 }
 0x206   :  { %v533_v21 = vadd.f32 %v532_v20, %v317_v2  ;;  %v534_v22 = vpop.f32.mrb[7].mxu1  ;;  %749 = vmatmul.mubr.bf16.vlgmr.msra.gmra.mrb[16].mxu0 %v573_v16  ;;  %v561_v24 = vmax.f32 %v529_v59, 0.0 }
 0x207   :  { %v535_v23 = vadd.f32 %v534_v22, %v1487_v3  ;;  %1127 = vmatpush3.bf16.msra.mxu0 %v1238_v63  ;;  %v562_v27 = vmax.f32 %v531_v19, 0.0  ;;  %v1243_v63 = vld [vmem:[#allocation7 + $0x28] sm:$0xff]  }
 0x208   :  { %v563_v25 = vmax.f32 %v533_v21, 0.0  ;;  %1128 = vmatprep.subr.bf16.mxu0 %v1239_v18 }
 0x209   :  { %v564_v28 = vmax.f32 %v535_v23, 0.0 }
 0x20a   :  { %v575_v29 = vpack.c.bf16 %v563_v25, %v561_v24 }
 0x20b   :  { %v576_v30 = vpack.c.bf16 %v564_v28, %v562_v27  ;;  %v538_v31 = vpop.f32.mrb[8].mxu1  ;;  %1129 = vmatpush3.bf16.msra.mxu0 %v1239_v18 }
 0x20c   :  { %v539_v32 = vadd.f32 %v538_v31, %v317_v2  ;;  %v540_v33 = vpop.f32.mrb[9].mxu1  ;;  %1130 = vmatprep.subr.bf16.mxu0 %v1240_v26 }
 0x20d   :  { %v541_v34 = vadd.f32 %v540_v33, %v1487_v3  ;;  %v542_v35 = vpop.f32.mrb[10].mxu1  ;;  %756 = vmatprep.mubr.bf16.mxu0 %v576_v30 }
 0x20e   :  { %v543_v36 = vadd.f32 %v542_v35, %v317_v2  ;;  %v544_v37 = vpop.f32.mrb[11].mxu1  ;;  %757 = vmatmul.mubr.bf16.gmra.mrb[20].mxu0 %v575_v29  ;;  %v565_v39 = vmax.f32 %v539_v32, 0.0 }
 0x20f   :  { %v545_v38 = vadd.f32 %v544_v37, %v1487_v3  ;;  %1131 = vmatpush3.bf16.msra.mxu0 %v1240_v26  ;;  %v566_v41 = vmax.f32 %v541_v34, 0.0 }
 0x210   :  { %v567_v40 = vmax.f32 %v543_v36, 0.0  ;;  %1132 = vmatprep.subr.bf16.mxu0 %v1241_v61 }
 0x211   :  { %v568_v42 = vmax.f32 %v545_v38, 0.0 }
 0x212   :  { %v577_v43 = vpack.c.bf16 %v567_v40, %v565_v39 }
 0x213   :  { %v578_v44 = vpack.c.bf16 %v568_v42, %v566_v41  ;;  %v548_v45 = vpop.f32.mrb[12].mxu1  ;;  %1133 = vmatpush3.bf16.msra.mxu0 %v1241_v61 }
 0x214   :  { %v549_v46 = vadd.f32 %v548_v45, %v317_v2  ;;  %v550_v47 = vpop.f32.mrb[13].mxu1  ;;  %1134 = vmatprep.subr.bf16.mxu0 %v1242_v1  ;;  %v1063_v45 = vld [vmem:[%s1546_s8] ss:$0 sm:$0xff] }
 0x215   :  { %v551_v48 = vadd.f32 %v550_v47, %v1487_v3  ;;  %v552_v49 = vpop.f32.mrb[14].mxu1  ;;  %764 = vmatprep.mubr.bf16.mxu0 %v578_v44 }
 0x216   :  { %v553_v50 = vadd.f32 %v552_v49, %v317_v2  ;;  %v554_v51 = vpop.f32.mrb[15].mxu1  ;;  %765 = vmatmul.mubr.bf16.gmra.mrb[24].mxu0 %v577_v43  ;;  %v569_v53 = vmax.f32 %v549_v46, 0.0  ;;  %v1245_v2 = vld [vmem:[#allocation7 + $0x38] sm:$0xff]  }
 0x217   :  { %v555_v52 = vadd.f32 %v554_v51, %v1487_v3  ;;  %v570_v55 = vmax.f32 %v551_v48, 0.0  ;;  %1135 = vmatpush3.bf16.msra.mxu0 %v1242_v1  ;;  %v1072_v51 = vld [vmem:[%s1547_s9] ss:$0 sm:$0xff] }
 0x218   :  { %v571_v54 = vmax.f32 %v553_v50, 0.0  ;;  %1136 = vmatprep.subr.bf16.mxu0 %v1243_v63 }
 0x219   :  { %v572_v56 = vmax.f32 %v555_v52, 0.0 }
 0x21a   :  { %v579_v57 = vpack.c.bf16 %v571_v54, %v569_v53 }
 0x21b   :  { %v580_v58 = vpack.c.bf16 %v572_v56, %v570_v55  ;;  %1137 = vmatpush3.bf16.msra.mxu0 %v1243_v63 }
 0x21c   :  { %1138 = vmatprep.subr.bf16.mxu0 %v1244_v0 }
 0x21d   :  { %772 = vmatprep.mubr.bf16.mxu0 %v580_v58 }
 0x21e   :  { %773 = vmatmul.mubr.bf16.gmra.mrb[28].mxu0 %v579_v57 }
 0x21f   :  { %1139 = vmatpush3.bf16.msra.mxu0 %v1244_v0 }
 0x220   :  { %1140 = vmatprep.subr.bf16.mxu0 %v1245_v2 }
 0x223   :  { %1141 = vmatpush3.bf16.msra.mxu0 %v1245_v2 }
 0x2d9   :  { %v1090_v3 = vpop.f32.mrb[16].mxu0 }
 0x2da   :  { %v1091_v5 = vpop.f32.mrb[17].mxu0 }
 0x2db   :  { %v1092_v6 = vadd.f32 %v1091_v5, %v1090_v3  ;;  %v1093_v7 = vpop.f32.mrb[18].mxu0 }
 0x2dc   :  { %v1094_v8 = vpop.f32.mrb[19].mxu0 }
 0x2dd   :  { %v751_v9 = vadd.f32 %v1092_v6, %v1046_v4  ;;  %v1095_v10 = vadd.f32 %v1094_v8, %v1093_v7 }
 0x2df   :  { %v754_v11 = vadd.f32 %v1095_v10, %v1046_v4  ;;  %v781_v12 = vmax.f32 %v751_v9, 0.0 }
 0x2e1   :  { %v782_v13 = vmax.f32 %v754_v11, 0.0  ;;  %v1096_v14 = vpop.f32.mrb[20].mxu0 }
 0x2e2   :  { %v1097_v15 = vpop.f32.mrb[21].mxu0 }
 0x2e3   :  { %v1098_v16 = vadd.f32 %v1097_v15, %v1096_v14  ;;  %v1099_v60 = vpop.f32.mrb[22].mxu0  ;;  %v789_v17 = vpack.c.bf16 %v782_v13, %v781_v12 }
 0x2e4   :  { %v1100_v59 = vpop.f32.mrb[23].mxu0 }
 0x2e5   :  { %v759_v62 = vadd.f32 %v1098_v16, %v1046_v4  ;;  %v1101_v18 = vadd.f32 %v1100_v59, %v1099_v60  ;;  %1142 = vmatprep.mubr.bf16.mxu0 %v789_v17  ;;  %v1073_v17 = vld [vmem:[#allocation2] ss:$0 sm:$0xff] }
 0x2e7   :  { %v762_v19 = vadd.f32 %v1101_v18, %v1046_v4  ;;  %v783_v20 = vmax.f32 %v759_v62, 0.0 }
 0x2e9   :  { %v784_v21 = vmax.f32 %v762_v19, 0.0  ;;  %v1102_v22 = vpop.f32.mrb[24].mxu0 }
 0x2ea   :  { %v1103_v23 = vpop.f32.mrb[25].mxu0 }
 0x2eb   :  { %v790_v24 = vpack.c.bf16 %v784_v21, %v783_v20  ;;  %v1104_v25 = vadd.f32 %v1103_v23, %v1102_v22  ;;  %v1105_v26 = vpop.f32.mrb[26].mxu0 }
 0x2ec   :  { %v1106_v27 = vpop.f32.mrb[27].mxu0 }
 0x2ed   :  { %v767_v28 = vadd.f32 %v1104_v25, %v1046_v4  ;;  %v1107_v29 = vadd.f32 %v1106_v27, %v1105_v26  ;;  %1143 = vmatmul.mubr.bf16.vlgmr.msra.gmra.mrb[32].mxu0 %v790_v24 }
 0x2ef   :  { %v770_v30 = vadd.f32 %v1107_v29, %v1046_v4  ;;  %v785_v31 = vmax.f32 %v767_v28, 0.0 }
 0x2f1   :  { %v786_v32 = vmax.f32 %v770_v30, 0.0  ;;  %v1108_v33 = vpop.f32.mrb[28].mxu0 }
 0x2f2   :  { %v1109_v34 = vpop.f32.mrb[29].mxu0 }
 0x2f3   :  { %v1110_v35 = vadd.f32 %v1109_v34, %v1108_v33  ;;  %v1111_v36 = vpop.f32.mrb[30].mxu0  ;;  %v791_v37 = vpack.c.bf16 %v786_v32, %v785_v31 }
 0x2f4   :  { %v1112_v38 = vpop.f32.mrb[31].mxu0 }
 0x2f5   :  { %v775_v39 = vadd.f32 %v1110_v35, %v1046_v4  ;;  %v1113_v40 = vadd.f32 %v1112_v38, %v1111_v36  ;;  %1146 = vmatprep.mubr.bf16.mxu0 %v791_v37 }
 0x2f7   :  { %v778_v41 = vadd.f32 %v1113_v40, %v1046_v4  ;;  %v787_v42 = vmax.f32 %v775_v39, 0.0 }
 0x2f9   :  { %v788_v43 = vmax.f32 %v778_v41, 0.0 }
 0x2fb   :  { %v792_v44 = vpack.c.bf16 %v788_v43, %v787_v42 }
 0x2fd   :  { %1147 = vmatmul.mubr.bf16.gmra.mrb[36].mxu0 %v792_v44 }
 0x3c0   :  { %v1144_v46 = vpop.f32.mrb[32].mxu0 }
 0x3c1   :  { %v907_v47 = vadd.f32 %v1144_v46, %v1063_v45  ;;  %v898_v48 = vpop.f32.mrb[33].mxu0 }
 0x3c2   :  { %v899_v49 = vadd.f32 %v1063_v45, %v898_v48  ;;  %v1145_v50 = vpop.f32.mrb[34].mxu0 }
 0x3c3   :  { %v931_v52 = vmax.f32 %v907_v47, 0.0  ;;  %v910_v53 = vadd.f32 %v1145_v50, %v1063_v45  ;;  %v901_v54 = vpop.f32.mrb[35].mxu0 }
 0x3c4   :  { %v929_v55 = vmax.f32 %v899_v49, 0.0  ;;  %v902_v56 = vadd.f32 %v1063_v45, %v901_v54 }
 0x3c5   :  { %v932_v57 = vmax.f32 %v910_v53, 0.0  ;;  %v946_v58 = vmul.f32 %v1072_v51, %v931_v52 }
 0x3c6   :  { %v930_v61 = vmax.f32 %v902_v56, 0.0  ;;  %v944_v1 = vmul.f32 %v1072_v51, %v929_v55 }
 0x3c7   :  { %956 = vadd.xlane.f32.xlu1 %v946_v58  ;;  %v947_v63 = vmul.f32 %v1072_v51, %v932_v57 }
 0x3c8   :  { %952 = vadd.xlane.f32.xlu0 %v944_v1  ;;  %v945_v0 = vmul.f32 %v1072_v51, %v930_v61 }
 0x3cb   :  { %958 = vadd.xlane.f32.xlu1 %v947_v63 }
 0x3cc   :  { %954 = vadd.xlane.f32.xlu0 %v945_v0 }
 0x3d0   :  { %v1148_v2 = vpop.f32.mrb[36].mxu0 }
 0x3d1   :  { %v914_v3 = vpop.f32.mrb[37].mxu0  ;;  %v923_v4 = vadd.f32 %v1148_v2, %v1063_v45 }
 0x3d2   :  { %v915_v5 = vadd.f32 %v1063_v45, %v914_v3  ;;  %v1149_v6 = vpop.f32.mrb[38].mxu0 }
 0x3d3   :  { %v917_v7 = vpop.f32.mrb[39].mxu0  ;;  %v926_v9 = vadd.f32 %v1149_v6, %v1063_v45  ;;  %v935_v11 = vmax.f32 %v923_v4, 0.0 }
 0x3d4   :  { %v933_v8 = vmax.f32 %v915_v5, 0.0  ;;  %v918_v10 = vadd.f32 %v1063_v45, %v917_v7 }
 0x3d5   :  { %v936_v14 = vmax.f32 %v926_v9, 0.0  ;;  %v950_v16 = vmul.f32 %v1072_v51, %v935_v11 }
 0x3d6   :  { %v934_v12 = vmax.f32 %v918_v10, 0.0  ;;  %v948_v13 = vmul.f32 %v1072_v51, %v933_v8 }
 0x3d7   :  { %v951_v60 = vmul.f32 %v1072_v51, %v936_v14 }
 0x3d8   :  { %960 = vadd.xlane.f32.xlu0 %v948_v13  ;;  %v949_v15 = vmul.f32 %v1072_v51, %v934_v12 }
 0x3da   :  { %962 = vadd.xlane.f32.xlu1 %v949_v15 }
 0x3dc   :  { %964 = vadd.xlane.f32.xlu0 %v950_v16 }
 0x3de   :  { %966 = vadd.xlane.f32.xlu1 %v951_v60 }
 0x454   :  { %v957_v59 = vpop.xlane.xlu1 %956 }
 0x455   :  { %v977_v62 = vadd.f32 %v1073_v17, %v957_v59  ;;  %v953_v18 = vpop.xlane.xlu0 %952 }
 0x456   :  { %v975_v19 = vadd.f32 %v1073_v17, %v953_v18 }
 0x457   :  { %986 = vst.msk [vmem:[%s1549_s11 + $0x10] sm:$0xff] %vm983_vm1, %v977_v62 }
 0x458   :  { %984 = vst.msk [vmem:[%s1549_s11] sm:$0xff] %vm983_vm1, %v975_v19  ;;  %v959_v20 = vpop.xlane.xlu1 %958 }
 0x459   :  { %v978_v21 = vadd.f32 %v1073_v17, %v959_v20  ;;  %v955_v22 = vpop.xlane.xlu0 %954 }
 0x45a   :  { %v976_v23 = vadd.f32 %v1073_v17, %v955_v22 }
 0x45b   :  { %987 = vst.msk [vmem:[%s1549_s11 + $0x18] sm:$0xff] %vm983_vm1, %v978_v21 }
 0x45c   :  { %985 = vst.msk [vmem:[%s1549_s11 + $0x8] sm:$0xff] %vm983_vm1, %v976_v23 }
 0x465   :  { %v961_v24 = vpop.xlane.xlu0 %960 }
 0x466   :  { %v979_v25 = vadd.f32 %v1073_v17, %v961_v24 }
 0x467   :  { %v963_v26 = vpop.xlane.xlu1 %962 }
 0x468   :  { %988 = vst.msk [vmem:[%s1549_s11 + $0x20] sm:$0xff] %vm983_vm1, %v979_v25  ;;  %v980_v27 = vadd.f32 %v1073_v17, %v963_v26 }
 0x469   :  { %v965_v28 = vpop.xlane.xlu0 %964 }
 0x46a   :  { %989 = vst.msk [vmem:[%s1549_s11 + $0x28] sm:$0xff] %vm983_vm1, %v980_v27  ;;  %v981_v29 = vadd.f32 %v1073_v17, %v965_v28 }
 0x46b   :  { %v967_v30 = vpop.xlane.xlu1 %966 }
 0x46c   :  { %990 = vst.msk [vmem:[%s1549_s11 + $0x30] sm:$0xff] %vm983_vm1, %v981_v29  ;;  %v982_v31 = vadd.f32 %v1073_v17, %v967_v30 }
 0x46e   :  { %991 = vst.msk [vmem:[%s1549_s11 + $0x38] sm:$0xff] %vm983_vm1, %v982_v31 }
 0x46f   :  { %996 = vsyncpa [#allocation4], 1 }
 0x470   :  { %997 = vsyncpa [#allocation6], 1 }

</bundles_post_ra>
